<compile_context>
chip_gen: v6e
topology: v6e:2x2x1
jax: 0.10.0
libtpu: 0.0.40
codegen_flags: <defaults>
</compile_context>

<pallas_src>
import numpy as np
import jax
import jax.numpy as jnp
from jax.experimental import pallas as pl
from jax.experimental.pallas import tpu as pltpu


def _seq_tile(T, cap):
    """Largest sequence tile <= cap that divides T (multiple of 8 for sublane alignment)."""
    if T <= cap:
        return T
    for t in range(cap, 7, -1):
        if T % t == 0 and t % 8 == 0:
            return t
    # TODO(synk): pad T to a multiple of 128 instead of falling back to a whole-sequence tile.
    return T


def _vmem_limit(blocks, scratch=()):
    """Rough per-call VMEM estimate: 2x (double buffering) per block + scratch, 2x margin,
    clamped to [16 MiB, 64 MiB] (v7x physical VMEM is 64 MiB)."""
    total = 0
    for shape, dtype in blocks:
        total += 2 * int(np.prod(shape)) * jnp.dtype(dtype).itemsize
    for shape, dtype in scratch:
        total += int(np.prod(shape)) * jnp.dtype(dtype).itemsize
    return int(min(max(2 * total + (2 << 20), 16 << 20), 64 << 20))


# ---------------------------------------------------------------------------
# Kernel 1: LayerNorm + fused QKV projection + splat-weight features
#   grid: (batch, seq-tile)
# ---------------------------------------------------------------------------
def make_ln_qkv_splat_kernel(D):
    def kernel(x_ref, g_ref, b_ref, w_ref, a_ref, bm_ref, bq_ref, bk_ref,
               qw_ref, kw_ref, v_ref):
        x = x_ref[0]                                               # (t, D) f32
        mean = jnp.mean(x, axis=-1, keepdims=True)
        xc = x - mean
        var = jnp.mean(xc * xc, axis=-1, keepdims=True)
        normed = xc * jax.lax.rsqrt(var + 1e-5) * g_ref[...] + b_ref[...]

        # One fused (t, D) @ (D, 3D) matmul (bf16 operands when w_ref is bf16, f32 accumulate).
        qkv = jnp.dot(normed.astype(w_ref.dtype), w_ref[...],
                      preferred_element_type=jnp.float32)          # (t, 3D) f32
        q = qkv[:, 0 * D:1 * D]
        k = qkv[:, 1 * D:2 * D]
        v = qkv[:, 2 * D:3 * D]

        # Splat features (kept in f32): column (h, s) of A/B encodes
        # coef[h,s] * ||x_h - c_{h,s}||^2; amplitude & 1/temperature are folded into bias_q.
        def splat_weights(z, bias):
            f = (jnp.dot(z * z, a_ref[...], preferred_element_type=jnp.float32)
                 + jnp.dot(z, bm_ref[...], preferred_element_type=jnp.float32)
                 + bias)
            return jnp.exp(f)

        qw_ref[0] = splat_weights(q, bq_ref[...]).astype(qw_ref.dtype)
        kw_ref[0] = splat_weights(k, bk_ref[...]).astype(kw_ref.dtype)
        v_ref[0] = v.astype(v_ref.dtype)

    return kernel


# ---------------------------------------------------------------------------
# Kernel 2: Gaussian-splat attention (flash-style online softmax over key tiles)
#           + out-projection + residual.   grid: (batch, q-tile, k-tile)
# ---------------------------------------------------------------------------
def make_gsa_kernel(H, S, hd):
    def kernel(qw_ref, kw_ref, v_ref, res_ref, wo_ref, ex_ref, o_ref,
               m_s, l_s, acc_s):
        j = pl.program_id(2)

        @pl.when(j == 0)
        def _init():
            m_s[...] = jnp.full(m_s.shape, -jnp.inf, dtype=m_s.dtype)
            l_s[...] = jnp.zeros(l_s.shape, dtype=l_s.dtype)
            acc_s[...] = jnp.zeros(acc_s.shape, dtype=acc_s.dtype)

        q_w = qw_ref[0]                                            # (tq, H*S)
        k_w = kw_ref[0]                                            # (tk, H*S)
        v = v_ref[0]                                               # (tk, D)

        # Per-head flash update.  H is small and static; each head's temporaries are written
        # straight into scratch, bounding live ranges.  A fori_loop would force dynamic
        # sub-128-lane slicing at h*S / h*hd offsets, which lowers worse.
        # TODO(synk): batch the H logits matmuls via an (H, tq, S) x (H, tk, S) dot_general if
        # the per-head K=S contraction shows up as the MXU bottleneck in profiles.
        for h in range(H):
            qh = q_w[:, h * S:(h + 1) * S]                         # (tq, S)
            kh = k_w[:, h * S:(h + 1) * S]                         # (tk, S)
            s = jax.lax.dot_general(qh, kh, (((1,), (1,)), ((), ())),
                                    preferred_element_type=jnp.float32)   # (tq, tk) f32
            m_prev = m_s[:, h:h + 1]                               # (tq, 1)
            m_new = jnp.maximum(m_prev, jnp.max(s, axis=-1, keepdims=True))
            alpha = jnp.exp(m_prev - m_new)
            p = jnp.exp(s - m_new)                                 # (tq, tk) f32
            l_s[:, h:h + 1] = alpha * l_s[:, h:h + 1] + jnp.sum(p, axis=-1, keepdims=True)
            pv = jnp.dot(p.astype(v.dtype), v[:, h * hd:(h + 1) * hd],
                         preferred_element_type=jnp.float32)       # (tq, hd)
            acc_s[:, h * hd:(h + 1) * hd] = alpha * acc_s[:, h * hd:(h + 1) * hd] + pv
            m_s[:, h:h + 1] = m_new

        @pl.when(j == pl.num_programs(2) - 1)
        def _finish():
            l = l_s[...]                                           # (tq, H)
            inv = pl.reciprocal(l, approx=True)                    # EUP
            inv = inv * (2.0 - l * inv)        # one Newton step -> f32-accurate, cheap VPU
            # Expand per-head 1/l into a (tq, D) column scale with a tiny K=H matmul
            # (avoids H masked column stores in the epilogue).
            scale = jnp.dot(inv, ex_ref[...], preferred_element_type=jnp.float32)
            out = acc_s[...] * scale                               # (tq, D) f32
            o_ref[0] = res_ref[0] + jnp.dot(out.astype(wo_ref.dtype), wo_ref[...],
                                            preferred_element_type=jnp.float32)

    return kernel


# ---------------------------------------------------------------------------
# One-time parameter preparation
# ---------------------------------------------------------------------------
def prepare_params(params, cfg, use_bf16=False):
    D, H, S, hd = cfg["dim"], cfg["n_heads"], cfg["n_splats"], cfg["head_dim"]
    HS = H * S

    centers = params["splat_centers"] + params["splat_deltas"] * \
        jax.nn.sigmoid(params["movement_scale"]) * 0.2                        # (H, S, hd)
    scales = jnp.clip(jnp.exp(params["splat_log_scales"]), 0.01, 2.0)         # (H, S)
    amps = jnp.clip(jnp.exp(params["splat_log_amplitudes"]), 1e-6, 10.0)      # (H, S)
    temp = jnp.clip(params["temperature"], 0.1, 10.0)
    coef = -0.5 / (scales ** 2 + 1e-8)                                        # (H, S)

    # Block-diagonal splat-feature matrices.  With x rows in head-concat layout,
    #   (x*x) @ A + x @ B + bias  ==  coef[h,s] * ||x_h - c_{h,s}||^2   for column (h, s).
    A = jnp.zeros((D, HS), jnp.float32)
    Bm = jnp.zeros((D, HS), jnp.float32)
    for h in range(H):
        r, c = slice(h * hd, (h + 1) * hd), slice(h * S, (h + 1) * S)
        A = A.at[r, c].set(jnp.broadcast_to(coef[h][None, :], (hd, S)))
        Bm = Bm.at[r, c].set(centers[h].T * (-2.0 * coef[h])[None, :])
    c_sq = jnp.sum(centers * centers, axis=-1)                                # (H, S)
    bias_k = (coef * c_sq).reshape(1, HS)
    bias_q = bias_k + jnp.log(amps / temp).reshape(1, HS)   # fold amplitude & 1/temperature

    # Head -> column expansion matrix (H, D): expand[h, h*hd:(h+1)*hd] = 1.
    expand = jnp.zeros((H, D), jnp.float32)
    for h in range(H):
        expand = expand.at[h, h * hd:(h + 1) * hd].set(1.0)

    mm_dtype = jnp.bfloat16 if use_bf16 else jnp.float32
    return {
        "gamma": params["ln_gamma"].reshape(1, D).astype(jnp.float32),
        "beta": params["ln_beta"].reshape(1, D).astype(jnp.float32),
        "w_qkv_t": params["w_qkv"].T.astype(mm_dtype),      # (D, 3D): [q | k | v] columns
        "w_out_t": params["w_out"].T.astype(mm_dtype),      # (D, D)
        "A": A, "B": Bm, "bias_q": bias_q, "bias_k": bias_k,
        "expand": expand,
        "mm_dtype": mm_dtype,
    }


# ---------------------------------------------------------------------------
# Forward wrapper
# ---------------------------------------------------------------------------
def gsa_layer_forward(hidden, prep, cfg):
    B, T, D = hidden.shape
    H, S, hd = cfg["n_heads"], cfg["n_splats"], cfg["head_dim"]
    HS = H * S
    mmdt = prep["mm_dtype"]
    itm = jnp.dtype(mmdt).itemsize

    # ---- Kernel 1: LayerNorm + QKV + splat weights (lane-dense (t, ·) tiles) ----
    t1 = _seq_tile(T, cap=512)
    k1_blocks = [((t1, D), jnp.float32), ((D, 3 * D), mmdt),
                 ((D, HS), jnp.float32), ((D, HS), jnp.float32),
                 ((t1, HS), mmdt), ((t1, HS), mmdt), ((t1, D), mmdt)]
    qw, kw, v = pl.pallas_call(
        make_ln_qkv_splat_kernel(D),
        out_shape=[jax.ShapeDtypeStruct((B, T, HS), mmdt),
                   jax.ShapeDtypeStruct((B, T, HS), mmdt),
                   jax.ShapeDtypeStruct((B, T, D), mmdt)],
        grid=(B, T // t1),
        in_specs=[
            pl.BlockSpec((1, t1, D), lambda b, i: (b, i, 0)),      # hidden
            pl.BlockSpec((1, D), lambda b, i: (0, 0)),             # ln gamma
            pl.BlockSpec((1, D), lambda b, i: (0, 0)),             # ln beta
            pl.BlockSpec((D, 3 * D), lambda b, i: (0, 0)),         # fused qkv weight (resident)
            pl.BlockSpec((D, HS), lambda b, i: (0, 0)),            # A  (resident)
            pl.BlockSpec((D, HS), lambda b, i: (0, 0)),            # B  (resident)
            pl.BlockSpec((1, HS), lambda b, i: (0, 0)),            # bias_q
            pl.BlockSpec((1, HS), lambda b, i: (0, 0)),            # bias_k
        ],
        out_specs=[pl.BlockSpec((1, t1, HS), lambda b, i: (b, i, 0)),
                   pl.BlockSpec((1, t1, HS), lambda b, i: (b, i, 0)),
                   pl.BlockSpec((1, t1, D), lambda b, i: (b, i, 0))],
        compiler_params=pltpu.CompilerParams(
            dimension_semantics=("parallel", "parallel"),
            vmem_limit_bytes=_vmem_limit(k1_blocks)),
        cost_estimate=pl.CostEstimate(
            flops=int(B * T * (2 * D * 3 * D + 8 * D * HS)),
            transcendentals=int(B * T * (2 * HS + 1)),
            bytes_accessed=int(B * T * D * 4 + B * T * (2 * HS + D) * itm
                               + (3 * D * D) * itm + (2 * D * HS) * 4)),
    )(hidden, prep["gamma"], prep["beta"], prep["w_qkv_t"], prep["A"], prep["B"],
      prep["bias_q"], prep["bias_k"])

    # ---- Kernel 2: flash GSA + out-projection + residual ------------------------
    tq = _seq_tile(T, cap=256)
    tk = _seq_tile(T, cap=256)
    # NOTE: if profiling shows exposed DMA on the k/v (innermost-axis) streams, add
    # pipeline_mode=pl.Buffered(3) to their BlockSpecs.
    k2_blocks = [((tq, HS), mmdt), ((tk, HS), mmdt), ((tk, D), mmdt),
                 ((tq, D), jnp.float32), ((D, D), mmdt), ((H, D), jnp.float32),
                 ((tq, D), jnp.float32)]
    k2_scratch = [((tq, 128), jnp.float32)] * 2 + [((tq, D), jnp.float32)]
    out = pl.pallas_call(
        make_gsa_kernel(H, S, hd),
        out_shape=jax.ShapeDtypeStruct((B, T, D), jnp.float32),
        grid=(B, T // tq, T // tk),
        in_specs=[
            pl.BlockSpec((1, tq, HS), lambda b, i, j: (b, i, 0)),  # q splat weights
            pl.BlockSpec((1, tk, HS), lambda b, i, j: (b, j, 0)),  # k splat weights
            pl.BlockSpec((1, tk, D), lambda b, i, j: (b, j, 0)),   # v
            pl.BlockSpec((1, tq, D), lambda b, i, j: (b, i, 0)),   # residual
            pl.BlockSpec((D, D), lambda b, i, j: (0, 0)),          # w_out (resident)
            pl.BlockSpec((H, D), lambda b, i, j: (0, 0)),          # head->column expansion
        ],
        out_specs=pl.BlockSpec((1, tq, D), lambda b, i, j: (b, i, 0)),
        scratch_shapes=[
            pltpu.VMEM((tq, H), jnp.float32),    # running max  m  (head = lane column)
            pltpu.VMEM((tq, H), jnp.float32),    # running sum  l
            pltpu.VMEM((tq, D), jnp.float32),    # head-concatenated accumulator
        ],
        compiler_params=pltpu.CompilerParams(
            dimension_semantics=("parallel", "parallel", "arbitrary"),
            vmem_limit_bytes=_vmem_limit(k2_blocks, k2_scratch)),
        cost_estimate=pl.CostEstimate(
            flops=int(2 * B * T * T * (HS + D) + 2 * B * T * D * (D + H)),
            transcendentals=int(B * T * T * H),
            bytes_accessed=int(B * (T // tq) * T * (HS + D) * itm + B * T * HS * itm
                               + 2 * B * T * D * 4 + D * D * itm)),
    )(qw, kw, v, hidden, prep["w_out_t"], prep["expand"])
    return out


# ---------------------------------------------------------------------------
# Pure-JAX reference (mirrors the PyTorch forward exactly) for validation.
# ---------------------------------------------------------------------------
def reference_forward(hidden, params, cfg):
    B, T, D = hidden.shape
    H, S, hd = cfg["n_heads"], cfg["n_splats"], cfg["head_dim"]

    mean = jnp.mean(hidden, axis=-1, keepdims=True)
    var = jnp.mean((hidden - mean) ** 2, axis=-1, keepdims=True)
    normed = (hidden - mean) / jnp.sqrt(var + 1e-5) * params["ln_gamma"] + params["ln_beta"]

    qkv = normed @ params["w_qkv"].T
    qkv = qkv.reshape(B, T, 3, H, hd)
    q, k, v = qkv[:, :, 0], qkv[:, :, 1], qkv[:, :, 2]   # (B, T, H, hd)

    centers = params["splat_centers"] + params["splat_deltas"] * \
        jax.nn.sigmoid(params["movement_scale"]) * 0.2
    scales = jnp.clip(jnp.exp(params["splat_log_scales"]), 0.01, 2.0)
    amps = jnp.clip(jnp.exp(params["splat_log_amplitudes"]), 1e-6, 10.0)

    logits = jnp.zeros((B, T, T, H), jnp.float32)
    for h in range(H):
        qd = jnp.sum((q[:, :, h][:, :, None, :] - centers[h][None, None]) ** 2, axis=-1)
        kd = jnp.sum((k[:, :, h][:, :, None, :] - centers[h][None, None]) ** 2, axis=-1)
        qw = jnp.exp(-0.5 * qd / (scales[h] ** 2 + 1e-8))
        kw = jnp.exp(-0.5 * kd / (scales[h] ** 2 + 1e-8))
        logits = logits.at[:, :, :, h].set(jnp.einsum("bis,bjs,s->bij", qw, kw, amps[h]))

    temp = jnp.clip(params["temperature"], 0.1, 10.0)
    attn = jax.nn.softmax(logits / temp, axis=2)
    out = jnp.einsum("btjh,bjhd->bthd", attn, v).reshape(B, T, D)
    return hidden + out @ params["w_out"].T


# ---------------------------------------------------------------------------
def init_params(key, dim, n_heads, n_splats):
    hd = dim // n_heads
    ks = jax.random.split(key, 5)

    def xavier_uniform(k, shape, gain):
        fan_out, fan_in = shape
        bound = gain * np.sqrt(6.0 / (fan_in + fan_out))
        return jax.random.uniform(k, shape, jnp.float32, -bound, bound)

    return {
        "splat_centers": jax.random.normal(ks[0], (n_heads, n_splats, hd)) * 0.2,
        "splat_deltas": jnp.zeros((n_heads, n_splats, hd), jnp.float32),
        "splat_log_scales": jax.random.normal(ks[1], (n_heads, n_splats)) * 0.2 + np.log(0.5),
        "splat_log_amplitudes": jax.random.normal(ks[2], (n_heads, n_splats)) * 0.1 - 0.5,
        "movement_scale": jnp.float32(0.08),
        "temperature": jnp.float32(1.0),
        "w_qkv": xavier_uniform(ks[3], (3 * dim, dim), 0.5),   # torch Linear (out, in) layout
        "w_out": xavier_uniform(ks[4], (dim, dim), 0.5),
        "ln_gamma": jnp.ones((dim,), jnp.float32),
        "ln_beta": jnp.zeros((dim,), jnp.float32),
    }


def _run_case(cfg, B, T, key, use_bf16, rtol, atol):
    pkey, xkey = jax.random.split(key)
    params = init_params(pkey, cfg["dim"], cfg["n_heads"], cfg["n_splats"])
    hidden = jax.random.normal(xkey, (B, T, cfg["dim"]), jnp.float32)
    prep = prepare_params(params, cfg, use_bf16=use_bf16)
    out = jax.block_until_ready(gsa_layer_forward(hidden, prep, cfg))
    ref = jax.block_until_ready(reference_forward(hidden, params, cfg))
    np.testing.assert_allclose(np.asarray(out), np.asarray(ref), rtol=rtol, atol=atol)


if __name__ == "__main__":
    key = jax.random.PRNGKey(0)
    k1, k2, k3 = jax.random.split(key, 3)

    # Small demo config (instruction-sized shapes): dim=32, 4 heads, 8 splats; B=2, T=8.
    cfg_small = {"dim": 32, "n_heads": 4, "n_splats": 8, "head_dim": 8}
    _run_case(cfg_small, B=2, T=8, key=k1, use_bf16=False, rtol=1e-3, atol=1e-4)

    # Module-default config (GSAConfig: dim=256, 8 heads, 16 splats), multi-tile grid, f32.
    cfg_full = {"dim": 256, "n_heads": 8, "n_splats": 16, "head_dim": 32}
    _run_case(cfg_full, B=2, T=512, key=k2, use_bf16=False, rtol=1e-3, atol=1e-4)

    # bf16 MXU-operand fast path (v6e/v7x); looser tolerance (bf16 operands, f32 accumulate).
    _run_case(cfg_full, B=2, T=512, key=k3, use_bf16=True, rtol=5e-2, atol=5e-2)

    print("KERNEL_OK")
</pallas_src>

<mosaic_0001>
module attributes {stable_mosaic.version = 11 : i64} {
  func.func @kernel(%arg0: i32, %arg1: i32, %arg2: memref<1x8x32xf32, #tpu.memory_space<vmem>>, %arg3: memref<1x32xf32, #tpu.memory_space<vmem>>, %arg4: memref<1x32xf32, #tpu.memory_space<vmem>>, %arg5: memref<32x96xf32, #tpu.memory_space<vmem>>, %arg6: memref<32x32xf32, #tpu.memory_space<vmem>>, %arg7: memref<32x32xf32, #tpu.memory_space<vmem>>, %arg8: memref<1x32xf32, #tpu.memory_space<vmem>>, %arg9: memref<1x32xf32, #tpu.memory_space<vmem>>, %arg10: memref<1x8x32xf32, #tpu.memory_space<vmem>>, %arg11: memref<1x8x32xf32, #tpu.memory_space<vmem>>, %arg12: memref<1x8x32xf32, #tpu.memory_space<vmem>>) attributes {dimension_semantics = [#tpu.dimension_semantics<parallel>, #tpu.dimension_semantics<parallel>], iteration_bounds = array<i64: 2, 1>, scalar_prefetch = 0 : i64, scratch_operands = 0 : i64, tpu.core_type = #tpu.core_type<tc>, window_params = [{transform_indices = @transform_0, window_bounds = array<i64: 1, 8, 32>}, {pipeline_mode = #tpu.pipeline_mode<synchronous>, transform_indices = @transform_1, window_bounds = array<i64: 1, 32>}, {pipeline_mode = #tpu.pipeline_mode<synchronous>, transform_indices = @transform_2, window_bounds = array<i64: 1, 32>}, {pipeline_mode = #tpu.pipeline_mode<synchronous>, transform_indices = @transform_3, window_bounds = array<i64: 32, 96>}, {pipeline_mode = #tpu.pipeline_mode<synchronous>, transform_indices = @transform_4, window_bounds = array<i64: 32, 32>}, {pipeline_mode = #tpu.pipeline_mode<synchronous>, transform_indices = @transform_5, window_bounds = array<i64: 32, 32>}, {pipeline_mode = #tpu.pipeline_mode<synchronous>, transform_indices = @transform_6, window_bounds = array<i64: 1, 32>}, {pipeline_mode = #tpu.pipeline_mode<synchronous>, transform_indices = @transform_7, window_bounds = array<i64: 1, 32>}, {transform_indices = @transform_8, window_bounds = array<i64: 1, 8, 32>}, {transform_indices = @transform_9, window_bounds = array<i64: 1, 8, 32>}, {transform_indices = @transform_10, window_bounds = array<i64: 1, 8, 32>}]} {
    %c0 = arith.constant 0 : index
    %c0_0 = arith.constant 0 : index
    %c0_1 = arith.constant 0 : index
    %0 = vector.load %arg2[%c0, %c0_0, %c0_1] : memref<1x8x32xf32, #tpu.memory_space<vmem>>, vector<1x8x32xf32>
    %1 = vector.shape_cast %0 : vector<1x8x32xf32> to vector<8x32xf32>
    %cst = arith.constant dense<0.000000e+00> : vector<8xf32>
    %2 = vector.multi_reduction <add>, %1, %cst [1] : vector<8x32xf32> to vector<8xf32>
    %3 = vector.shape_cast %2 : vector<8xf32> to vector<8x1xf32>
    %cst_2 = arith.constant 3.200000e+01 : f32
    %4 = vector.broadcast %cst_2 : f32 to vector<8x1xf32>
    %5 = arith.divf %3, %4 : vector<8x1xf32>
    %6 = vector.broadcast %5 : vector<8x1xf32> to vector<8x32xf32>
    %7 = arith.subf %1, %6 : vector<8x32xf32>
    %8 = arith.mulf %7, %7 : vector<8x32xf32>
    %cst_3 = arith.constant dense<0.000000e+00> : vector<8xf32>
    %9 = vector.multi_reduction <add>, %8, %cst_3 [1] : vector<8x32xf32> to vector<8xf32>
    %10 = vector.shape_cast %9 : vector<8xf32> to vector<8x1xf32>
    %cst_4 = arith.constant 3.200000e+01 : f32
    %11 = vector.broadcast %cst_4 : f32 to vector<8x1xf32>
    %12 = arith.divf %10, %11 : vector<8x1xf32>
    %cst_5 = arith.constant 9.99999974E-6 : f32
    %13 = vector.broadcast %cst_5 : f32 to vector<8x1xf32>
    %14 = arith.addf %12, %13 : vector<8x1xf32>
    %15 = math.rsqrt %14 : vector<8x1xf32>
    %16 = vector.broadcast %15 : vector<8x1xf32> to vector<8x32xf32>
    %17 = arith.mulf %7, %16 : vector<8x32xf32>
    %c0_6 = arith.constant 0 : index
    %c0_7 = arith.constant 0 : index
    %18 = vector.load %arg3[%c0_6, %c0_7] : memref<1x32xf32, #tpu.memory_space<vmem>>, vector<1x32xf32>
    %19 = vector.broadcast %18 : vector<1x32xf32> to vector<8x32xf32>
    %20 = arith.mulf %17, %19 : vector<8x32xf32>
    %c0_8 = arith.constant 0 : index
    %c0_9 = arith.constant 0 : index
    %21 = vector.load %arg4[%c0_8, %c0_9] : memref<1x32xf32, #tpu.memory_space<vmem>>, vector<1x32xf32>
    %22 = vector.broadcast %21 : vector<1x32xf32> to vector<8x32xf32>
    %23 = arith.addf %20, %22 : vector<8x32xf32>
    %c0_10 = arith.constant 0 : index
    %c0_11 = arith.constant 0 : index
    %24 = vector.load %arg5[%c0_10, %c0_11] : memref<32x96xf32, #tpu.memory_space<vmem>>, vector<32x96xf32>
    %cst_12 = arith.constant dense<0.000000e+00> : vector<8x96xf32>
    %25 = tpu.matmul %23, %24, %cst_12 {dimension_numbers = #tpu.dot_dimension_numbers<[1], [0], [0], [1], [0, 0, 1, 1], [], []>} : vector<8x32xf32>, vector<32x96xf32>, vector<8x96xf32> -> vector<8x96xf32>
    %26 = vector.extract_strided_slice %25 {offsets = [0, 0], sizes = [8, 32], strides = [1, 1]} : vector<8x96xf32> to vector<8x32xf32>
    %27 = vector.extract_strided_slice %25 {offsets = [0, 32], sizes = [8, 32], strides = [1, 1]} : vector<8x96xf32> to vector<8x32xf32>
    %28 = vector.extract_strided_slice %25 {offsets = [0, 64], sizes = [8, 32], strides = [1, 1]} : vector<8x96xf32> to vector<8x32xf32>
    %c0_13 = arith.constant 0 : index
    %c0_14 = arith.constant 0 : index
    %29 = vector.load %arg8[%c0_13, %c0_14] : memref<1x32xf32, #tpu.memory_space<vmem>>, vector<1x32xf32>
    %30 = arith.mulf %26, %26 : vector<8x32xf32>
    %c0_15 = arith.constant 0 : index
    %c0_16 = arith.constant 0 : index
    %31 = vector.load %arg6[%c0_15, %c0_16] : memref<32x32xf32, #tpu.memory_space<vmem>>, vector<32x32xf32>
    %cst_17 = arith.constant dense<0.000000e+00> : vector<8x32xf32>
    %32 = tpu.matmul %30, %31, %cst_17 {dimension_numbers = #tpu.dot_dimension_numbers<[1], [0], [0], [1], [0, 0, 1, 1], [], []>} : vector<8x32xf32>, vector<32x32xf32>, vector<8x32xf32> -> vector<8x32xf32>
    %c0_18 = arith.constant 0 : index
    %c0_19 = arith.constant 0 : index
    %33 = vector.load %arg7[%c0_18, %c0_19] : memref<32x32xf32, #tpu.memory_space<vmem>>, vector<32x32xf32>
    %cst_20 = arith.constant dense<0.000000e+00> : vector<8x32xf32>
    %34 = tpu.matmul %26, %33, %cst_20 {dimension_numbers = #tpu.dot_dimension_numbers<[1], [0], [0], [1], [0, 0, 1, 1], [], []>} : vector<8x32xf32>, vector<32x32xf32>, vector<8x32xf32> -> vector<8x32xf32>
    %35 = arith.addf %32, %34 : vector<8x32xf32>
    %36 = vector.broadcast %29 : vector<1x32xf32> to vector<8x32xf32>
    %37 = arith.addf %35, %36 : vector<8x32xf32>
    %38 = math.exp %37 : vector<8x32xf32>
    %c0_21 = arith.constant 0 : index
    %c0_22 = arith.constant 0 : index
    %c0_23 = arith.constant 0 : index
    %39 = vector.load %arg10[%c0_21, %c0_22, %c0_23] : memref<1x8x32xf32, #tpu.memory_space<vmem>>, vector<1x8x32xf32>
    %40 = vector.shape_cast %39 : vector<1x8x32xf32> to vector<8x32xf32>
    %41 = vector.shape_cast %38 : vector<8x32xf32> to vector<1x8x32xf32>
    tpu.vector_store %arg10[%c0_21, %c0_22, %c0_23], %41 {strides = array<i32>} : memref<1x8x32xf32, #tpu.memory_space<vmem>>, vector<1x8x32xf32>,
    %c0_24 = arith.constant 0 : index
    %c0_25 = arith.constant 0 : index
    %42 = vector.load %arg9[%c0_24, %c0_25] : memref<1x32xf32, #tpu.memory_space<vmem>>, vector<1x32xf32>
    %43 = arith.mulf %27, %27 : vector<8x32xf32>
    %c0_26 = arith.constant 0 : index
    %c0_27 = arith.constant 0 : index
    %44 = vector.load %arg6[%c0_26, %c0_27] : memref<32x32xf32, #tpu.memory_space<vmem>>, vector<32x32xf32>
    %cst_28 = arith.constant dense<0.000000e+00> : vector<8x32xf32>
    %45 = tpu.matmul %43, %44, %cst_28 {dimension_numbers = #tpu.dot_dimension_numbers<[1], [0], [0], [1], [0, 0, 1, 1], [], []>} : vector<8x32xf32>, vector<32x32xf32>, vector<8x32xf32> -> vector<8x32xf32>
    %c0_29 = arith.constant 0 : index
    %c0_30 = arith.constant 0 : index
    %46 = vector.load %arg7[%c0_29, %c0_30] : memref<32x32xf32, #tpu.memory_space<vmem>>, vector<32x32xf32>
    %cst_31 = arith.constant dense<0.000000e+00> : vector<8x32xf32>
    %47 = tpu.matmul %27, %46, %cst_31 {dimension_numbers = #tpu.dot_dimension_numbers<[1], [0], [0], [1], [0, 0, 1, 1], [], []>} : vector<8x32xf32>, vector<32x32xf32>, vector<8x32xf32> -> vector<8x32xf32>
    %48 = arith.addf %45, %47 : vector<8x32xf32>
    %49 = vector.broadcast %42 : vector<1x32xf32> to vector<8x32xf32>
    %50 = arith.addf %48, %49 : vector<8x32xf32>
    %51 = math.exp %50 : vector<8x32xf32>
    %c0_32 = arith.constant 0 : index
    %c0_33 = arith.constant 0 : index
    %c0_34 = arith.constant 0 : index
    %52 = vector.load %arg11[%c0_32, %c0_33, %c0_34] : memref<1x8x32xf32, #tpu.memory_space<vmem>>, vector<1x8x32xf32>
    %53 = vector.shape_cast %52 : vector<1x8x32xf32> to vector<8x32xf32>
    %54 = vector.shape_cast %51 : vector<8x32xf32> to vector<1x8x32xf32>
    tpu.vector_store %arg11[%c0_32, %c0_33, %c0_34], %54 {strides = array<i32>} : memref<1x8x32xf32, #tpu.memory_space<vmem>>, vector<1x8x32xf32>,
    %c0_35 = arith.constant 0 : index
    %c0_36 = arith.constant 0 : index
    %c0_37 = arith.constant 0 : index
    %55 = vector.load %arg12[%c0_35, %c0_36, %c0_37] : memref<1x8x32xf32, #tpu.memory_space<vmem>>, vector<1x8x32xf32>
    %56 = vector.shape_cast %55 : vector<1x8x32xf32> to vector<8x32xf32>
    %57 = vector.shape_cast %28 : vector<8x32xf32> to vector<1x8x32xf32>
    tpu.vector_store %arg12[%c0_35, %c0_36, %c0_37], %57 {strides = array<i32>} : memref<1x8x32xf32, #tpu.memory_space<vmem>>, vector<1x8x32xf32>,
    return
  }
  func.func @transform_0(%arg0: i32, %arg1: i32) -> (i32, i32, i32) {
    %c0_i32 = arith.constant 0 : i32
    %c0_i32_0 = arith.constant 0 : i32
    return %arg0, %arg1, %c0_i32 : i32, i32, i32
  }
  func.func @transform_1(%arg0: i32, %arg1: i32) -> (i32, i32) {
    %c0_i32 = arith.constant 0 : i32
    %c0_i32_0 = arith.constant 0 : i32
    %c0_i32_1 = arith.constant 0 : i32
    return %c0_i32, %c0_i32_0 : i32, i32
  }
  func.func @transform_2(%arg0: i32, %arg1: i32) -> (i32, i32) {
    %c0_i32 = arith.constant 0 : i32
    %c0_i32_0 = arith.constant 0 : i32
    %c0_i32_1 = arith.constant 0 : i32
    return %c0_i32, %c0_i32_0 : i32, i32
  }
  func.func @transform_3(%arg0: i32, %arg1: i32) -> (i32, i32) {
    %c0_i32 = arith.constant 0 : i32
    %c0_i32_0 = arith.constant 0 : i32
    %c0_i32_1 = arith.constant 0 : i32
    return %c0_i32, %c0_i32_0 : i32, i32
  }
  func.func @transform_4(%arg0: i32, %arg1: i32) -> (i32, i32) {
    %c0_i32 = arith.constant 0 : i32
    %c0_i32_0 = arith.constant 0 : i32
    %c0_i32_1 = arith.constant 0 : i32
    return %c0_i32, %c0_i32_0 : i32, i32
  }
  func.func @transform_5(%arg0: i32, %arg1: i32) -> (i32, i32) {
    %c0_i32 = arith.constant 0 : i32
    %c0_i32_0 = arith.constant 0 : i32
    %c0_i32_1 = arith.constant 0 : i32
    return %c0_i32, %c0_i32_0 : i32, i32
  }
  func.func @transform_6(%arg0: i32, %arg1: i32) -> (i32, i32) {
    %c0_i32 = arith.constant 0 : i32
    %c0_i32_0 = arith.constant 0 : i32
    %c0_i32_1 = arith.constant 0 : i32
    return %c0_i32, %c0_i32_0 : i32, i32
  }
  func.func @transform_7(%arg0: i32, %arg1: i32) -> (i32, i32) {
    %c0_i32 = arith.constant 0 : i32
    %c0_i32_0 = arith.constant 0 : i32
    %c0_i32_1 = arith.constant 0 : i32
    return %c0_i32, %c0_i32_0 : i32, i32
  }
  func.func @transform_8(%arg0: i32, %arg1: i32) -> (i32, i32, i32) {
    %c0_i32 = arith.constant 0 : i32
    %c0_i32_0 = arith.constant 0 : i32
    return %arg0, %arg1, %c0_i32 : i32, i32, i32
  }
  func.func @transform_9(%arg0: i32, %arg1: i32) -> (i32, i32, i32) {
    %c0_i32 = arith.constant 0 : i32
    %c0_i32_0 = arith.constant 0 : i32
    return %arg0, %arg1, %c0_i32 : i32, i32, i32
  }
  func.func @transform_10(%arg0: i32, %arg1: i32) -> (i32, i32, i32) {
    %c0_i32 = arith.constant 0 : i32
    %c0_i32_0 = arith.constant 0 : i32
    return %arg0, %arg1, %c0_i32 : i32, i32, i32
  }
}

</mosaic_0001>

<bundles_post_ra>
// kernel: tpu_custom_call.1
= control target key start
LH: loop header
LB: loop body
LE: loop exit
PB: predicated region body
PF: predicated region fallthrough
CT: control target
= control target key end

     0   :  { %s1996_s0 = inlined_call_operand.hbm [shape: f32[2,8,32], index: 0, kind: input, shape index: {}]   ;;  %s1997_s1 = inlined_call_operand.vmem [shape: f32[1,32], index: 1, kind: input, shape index: {}]   ;;  %s1998_s2 = inlined_call_operand.vmem [shape: f32[1,32], index: 2, kind: input, shape index: {}]   ;;  %s1999_s3 = inlined_call_operand.hbm [shape: f32[32,96], index: 3, kind: input, shape index: {}]   ;;  %s2000_s4 = inlined_call_operand.hbm [shape: f32[32,32], index: 4, kind: input, shape index: {}]   ;;  %s2001_s5 = inlined_call_operand.hbm [shape: f32[32,32], index: 5, kind: input, shape index: {}]   ;;  %s2002_s6 = inlined_call_operand.vmem [shape: f32[1,32], index: 6, kind: input, shape index: {}]   ;;  %s2003_s7 = inlined_call_operand.vmem [shape: f32[1,32], index: 7, kind: input, shape index: {}]   ;;  %s2004_s8 = inlined_call_operand.hbm [shape: f32[2,8,32], index: 8, kind: output, shape index: {0}]   ;;  %s2005_s9 = inlined_call_operand.hbm [shape: f32[2,8,32], index: 9, kind: output, shape index: {1}]   ;;  %s2006_s10 = inlined_call_operand.hbm [shape: f32[2,8,32], index: 10, kind: output, shape index: {2}]  }
   0x1   :  { %2013 = sst [smem:[#allocation22_spill]] %s1999_s3 }
   0x2   :  { %2014 = sst [smem:[#allocation23_spill]] %s2000_s4 }
   0x3   :  { %2015 = sst [smem:[#allocation24_spill]] %s2001_s5 }
   0x4   :  { %16 = vsyncpa [#allocation3], 0 }
   0x5   :  { %18 = vsyncpa [#allocation3 + $0x1], 0 }
   0x6   :  { %19 = vsyncpa [#allocation6], 0 }
   0x7   :  { %20 = vsyncpa [#allocation9], 0 }
   0x8   :  { %21 = vsyncpa [#allocation4], 0 }
   0x9   :  { %23 = vsyncpa [#allocation4 + $0x1], 0 }
   0xa   :  { %24 = vsyncpa [#allocation12], 0 }
   0xb   :  { %26 = vsyncpa [#allocation12 + $0x1], 0  ;;  %s1678_s13 = smov 0   ;;  %s1680_s14 = smov 0  }
   0xc   :  { %s1682_s15 = smov 0   ;;  %s1684_s16 = smov 0  }
   0xd   :  { %s1686_s17 = smov 0   ;;  %s1688_s18 = smov 0  }
   0xe LB: > { %2016 = sst [smem:[#allocation19_spill]] %s1588_s13  ;;  %s1709_s19 = sadd.s32 4294967295, %s1608_s18   ;;  %s1608_s18 = sphi %s1688_s18, %s32_s18   ;;  %s1604_s17 = sphi %s1686_s17, %s2044_s17   ;;  %s1600_s16 = sphi %s1684_s16, %s2043_s16   ;;  %s1596_s15 = sphi %s1682_s15, %s2042_s15   ;;  %s1592_s14 = sphi %s1680_s14, %s2041_s14   ;;  %s1588_s13 = sphi %s1678_s13, %s2040_s13  }
   0xf   : > { %s2007_s20 = sadd.s32 4294967294, %s1608_s18   ;;  %p66_p0 = scmp.ne.s32.totalorder %s1592_s14, %s1588_s13 }
  0x10   : > { %p2008_p1 = scmp.eq.s32.totalorder %s1709_s19, 0  ;;  %p245_p3 = scmp.eq.s32.totalorder %s2007_s20, 1 }
  0x11   : > { %p1131_p5 = scmp.ge.s32.totalorder %s1608_s18, 1  ;;  %p308_p7 = scmp.lt.s32.totalorder %s1608_s18, 3 }
  0x12   : > { %p1720_p4 = por %p2008_p1, %p66_p0  ;;  %p1725_p6 = por %p245_p3, %p66_p0 }
  0x13   : > { %p1730_p8 = pnand %p1131_p5, %p308_p7  ;;  %s1610_s24 = smov [#allocation5]  }
  0x14   : > { %s2017_s21 = scalar_select %p1720_p4, 1, 0 }
  0x15   : > { %s2018_s22 = scalar_select %p1725_p6, 1, 0 }
  0x16   : > { %s326_s25 = sshll.u32 %s1610_s24, 4  ;;  %p1263_p9 = pneg %p1730_p8  ;;  %s327_s25 = int_to_ptr.vmem [resolvable:$true] %s326_s25 }
  0x17   : > { %2019 = sst [smem:[#allocation20_spill]] %s2018_s22  ;;  %s1611_s27 = smov [#allocation7]  }
  0x18   : > { %p1739_p11 = pnand %p1263_p9, %p2008_p1  ;;  %s339_s28 = sshll.u32 %s1611_s27, 4  ;;  %s340_s28 = int_to_ptr.vmem [resolvable:$true] %s339_s28 }
  0x19   : > { %s1612_s29 = smov [#allocation8]   ;;  %s1369_s11 = scalar_lea.vmem %s327_s25, 512 }
  0x1a   : > { %s352_s30 = sshll.u32 %s1612_s29, 4  ;;  %p1360_p12 = pneg %p1739_p11  ;;  %s353_s30 = int_to_ptr.vmem [resolvable:$true] %s352_s30 }
  0x1b   : > { %p1370_p13 = scmp.ne.s32.totalorder %s327_s25, %s1369_s11  ;;  %p1377_p5 = scmp.lt.s32.totalorder %s327_s25, %s327_s25 }
  0x1c   : > { %p1378_p7 = scmp.lt.s32.totalorder %s1369_s11, %s1369_s11 }
  0x1d   : > { %p1372_p0 = pnand %p1370_p13, %p1360_p12 }
  0x1e   : > { %p1379_p9 = por %p1378_p7, %p1377_p5 }
  0x1f   : > { %p1373_p3 = pneg %p1372_p0 }
  0x21   : > { %p1380_p10 = pnand %p1379_p9, %p1373_p3 }
  0x23   : > { %1383 = shalt.err (!%p1380_p10)
}
  0x24   : > { %s1613_s12 = smov 128   ;;  %s1614_s24 = smov 8  }
  0x25   : > { %s2022_s3 = sld [smem:[#allocation22_spill]]  ;;  %s1395_s20 = scalar_lea.vmem %s340_s28, 512 }
  0x26   : > { %p1396_p1 = scmp.ne.s32.totalorder %s340_s28, %s1395_s20  ;;  %p1403_p2 = scmp.lt.s32.totalorder %s340_s28, %s340_s28 }
  0x27   : > { %p1404_p6 = scmp.lt.s32.totalorder %s1395_s20, %s1395_s20 }
  0x28   : > { %p1398_p13 = pnand %p1396_p1, %p1360_p12 }
  0x29   : > { %p1405_p5 = por %p1404_p6, %p1403_p2 }
  0x2a   : > { %p1399_p0 = pneg %p1398_p13 }
  0x2b   : > { %1266 = dma.hbm_to_vmem [thread:$0]  (!%p1739_p11), %s2022_s3, 512, %s327_s25, [#allocation6], %s1613_s12, %s1613_s12, %s1614_s24  }
  0x2c   : > { %p1406_p3 = pnand %p1405_p5, %p1399_p0 }
  0x2e   : > { %1409 = shalt.err (!%p1406_p3)
}
  0x2f   : > { %s2023_s4 = sld [smem:[#allocation23_spill]]  ;;  %s1421_s25 = scalar_lea.vmem %s353_s30, 512 }
  0x30   : > { %p1422_p10 = scmp.ne.s32.totalorder %s353_s30, %s1421_s25  ;;  %p1429_p9 = scmp.lt.s32.totalorder %s353_s30, %s353_s30 }
  0x31   : > { %p1430_p13 = scmp.lt.s32.totalorder %s1421_s25, %s1421_s25 }
  0x32   : > { %p1424_p7 = pnand %p1422_p10, %p1360_p12 }
  0x33   : > { %p1431_p4 = por %p1430_p13, %p1429_p9 }
  0x34   : > { %p1425_p1 = pneg %p1424_p7 }
  0x35   : > { %1269 = dma.hbm_to_vmem [thread:$0]  (!%p1739_p11), %s2023_s4, 512, %s340_s28, [#allocation6], %s1613_s12, %s1613_s12, %s1614_s24  }
  0x36   : > { %p1432_p2 = pnand %p1431_p4, %p1425_p1 }
  0x38   : > { %1435 = shalt.err (!%p1432_p2)
}
  0x39   : > { %s2024_s5 = sld [smem:[#allocation24_spill]]  ;;  %s53_s22 = sadd.s32 1, %s1596_s15 }
  0x3a   : > { %s44_s28 = sadd.s32 1, %s1604_s17  ;;  %p60_p4 = scmp.ne.s32.totalorder %s1596_s15, %s1592_s14 }
  0x3b   : > { %p46_p6 = scmp.ge.s32.totalorder %s44_s28, 2  ;;  %p61_p12 = scmp.eq.s32.totalorder %s1608_s18, 0 }
  0x3c   : > { %p2025_p0 = scmp.eq.s32.totalorder %s1709_s19, 1  ;;  %p1290_p3 = scmp.lt.s32.totalorder %s1608_s18, 2 }
  0x3d   : > { %s2046_s28 = smov (%p46_p6, %s44_s28), 0  ;;  %p62_p10 = por %p61_p12, %p60_p4 }
  0x3e   : > { %p1776_p5 = por %p2025_p0, %p60_p4  ;;  %2027 = sst [smem:[#allocation21_spill]] %s2046_s28 }
  0x3f   : > { %1272 = dma.hbm_to_vmem [thread:$0]  (!%p1739_p11), %s2024_s5, 512, %s353_s30, [#allocation9], %s1613_s12, %s1613_s12, %s1614_s24  }
  0x40   : > { %s372_s29 = sand.u32 1, %s1596_s15   ;;  %s48_s11 = ssub.s32 %s1604_s17, %s2046_s28 }
  0x41   : > { %p51_p7 = scmp.eq.s32.totalorder %s48_s11, 0  ;;  %s1136_s30 = sshll.u32 %s372_s29, 3 }
  0x42   : > { %s1137_s12 = sshll.u32 %s1604_s17, 7  ;;  %s376_s3 = scalar_lea.vmem [#allocation2], %s1136_s30 }
  0x43   : > { %s1788_s24 = scalar_select %p51_p7, %s1596_s15, %s53_s22  }
  0x44   : > { %s382_s27 = scalar_lea.hbm %s1996_s0, %s1137_s12  ;;  %s384_s4 = sshll.u32 %s376_s3, 4  ;;  %s385_s4 = int_to_ptr.vmem [resolvable:$true] %s384_s4 }
  0x45   : > { %p1795_p11 = pnand %p1290_p3, %p62_p10  ;;  %s373_s13 = scalar_lea.sflag [#allocation3], %s372_s29 }
  0x46   : > { %s1449_s11 = scalar_lea.vmem %s385_s4, 128  ;;  %s1615_s22 = smov [#allocation2]  }
  0x47   : > { %p1438_p1 = pneg %p1795_p11  ;;  %p1450_p9 = scmp.ne.s32.totalorder %s385_s4, %s1449_s11 }
  0x48   : > { %s1454_s28 = sshll.u32 %s1615_s22, 4  ;;  %s1455_s28 = int_to_ptr.vmem [resolvable:$false] %s1454_s28 }
  0x49   : > { %p1452_p13 = pnand %p1450_p9, %p1438_p1  ;;  %s1456_s12 = scalar_lea.vmem %s1455_s28, 256 }
  0x4a   : > { %p1457_p4 = scmp.lt.s32.totalorder %s385_s4, %s1455_s28  ;;  %p1458_p6 = scmp.lt.s32.totalorder %s1456_s12, %s1449_s11 }
  0x4b   : > { %p1453_p2 = pneg %p1452_p13 }
  0x4c   : > { %p1459_p12 = por %p1458_p6, %p1457_p4 }
  0x4e   : > { %p1460_p0 = pnand %p1459_p12, %p1453_p2 }
  0x50   : > { %1463 = shalt.err (!%p1460_p0)
}
  0x51   : > { %1276 = dma.hbm_to_vmem [thread:$0]  (!%p1795_p11), %s382_s27, 128, %s385_s4, %s373_s13  }
  0x52   : > { %393 = sbr.rel (%p1730_p8) target bundleno = 963 (0x3c3), region = 52  ;;  %s1806_s3 = sand.u32 (!%p1730_p8), 1, %s1592_s14  }
  0x53   : > { %s1809_s29 = sshll.u32 (!%p1730_p8), %s1806_s3, 3  ;;  %s396_s28 = scalar_lea.sflag (!%p1730_p8), [#allocation3], %s1806_s3 }
  0x54   : > { %s399_s30 = scalar_lea.vmem (!%p1730_p8), [#allocation2], %s1809_s29  ;;  %p2029_p3 = scmp.ne.s32.totalorder (!%p1730_p8), %s2017_s21, 0 }
  0x57   : > { %1567 = dma.done.wait (%p2029_p3), %s396_s28, 128  }
  0x58   : > { %1569 = vsyncadd (%p2029_p3), %s396_s28, 4294967168  ;;  %p2030_p10 = scmp.eq.s32.totalorder %s1709_s19, 0 }
  0x5a   : > { %1571 = dma.done.wait (%p2030_p10), [#allocation6], 1024   ;;  %p2031_p8 = pmov %p2030_p10 }
  0x5c   : > { %1573 = vsyncadd (%p2031_p8), [#allocation6], 4294966272  ;;  %p2032_p7 = pmov %p2031_p8 }
  0x5e   : > { %1575 = dma.done.wait (%p2032_p7), [#allocation9], 512   ;;  %p2033_p11 = pmov %p2032_p7 }
  0x5f   : > { %vm459_vm0 = vcmask 261120   ;;  %v458_v0 = vld [vmem:[%s399_s30] sm:$0xff]  ;;  %v1616_v8 = vmov 0.0   ;;  %vm1617_vm1 = vmmov 0   ;;  %v491_v10 = vld [vmem:[#allocation5 + $0x8] sm:$0xff]  ;;  %v490_v11 = vld [vmem:[#allocation5] sm:$0xff] }
  0x60   : > { %1577 = vsyncadd (%p2033_p11), [#allocation9], 4294966784  ;;  %v460_v1 = vsel %vm459_vm0, %v458_v0, 0.0  ;;  %v493_v7 = vld [vmem:[#allocation5 + $0x18] sm:$0xff]  ;;  %1188 = vmatprep.subr.mxu0 %v1616_v8  ;;  %v492_v9 = vld [vmem:[#allocation5 + $0x10] sm:$0xff]  ;;  %1196 = vmatprep.mubr.msk.f32.mxu0 %vm1617_vm1, %v1616_v8  ;;  %s1618_s23 = smov 64  }
  0x61   : > { %461 = vadd.xlane.f32.xlu0 %v460_v1  ;;  %1189 = vmatpush3.msra.mxu0 %v493_v7  ;;  %v576_v12 = vld [vmem:[#allocation8 + $0x18] sm:$0xff]  ;;  %v575_v13 = vld [vmem:[#allocation8 + $0x10] sm:$0xff]  ;;  %v574_v14 = vld [vmem:[#allocation8 + $0x8] sm:$0xff]  ;;  %s1619_s25 = smov 96   ;;  %s457_s20 = scalar_lea.vmem [#allocation13], %s1809_s29 }
  0x62   : > { %1199 = vmatprep.subr.mxu1 %v1616_v8  ;;  %1190 = vmatprep.subr.mxu0 %v1616_v8  ;;  %v1146_v19 = vld [vmem:[%s1997_s1] ss:$0 sm:$0xff]  ;;  %v572_v24 = vld [vmem:[#allocation7 + $0x18] sm:$0xff]  ;;  %v573_v26 = vld [vmem:[#allocation8] sm:$0xff]  ;;  %s1876_s22 = sshll.u32 %s1600_s16, 7  ;;  %s443_s12 = scalar_lea.vmem [#allocation10], %s1809_s29 }
  0x63   : > { %1207 = vmatprep.mubr.msk.f32.mxu1 %vm1617_vm1, %v1616_v8  ;;  %1191 = vmatpush3.msra.mxu0 %v492_v9  ;;  %v1147_v21 = vld [vmem:[%s1998_s2] ss:$0 sm:$0xff]  ;;  %v570_v27 = vld [vmem:[#allocation7 + $0x8] sm:$0xff]  ;;  %v569_v28 = vld [vmem:[#allocation7] sm:$0xff]  ;;  %s929_s28 = sshll.u32 %s443_s12, 4  ;;  %s1883_s5 = scalar_lea.hbm %s2004_s8, %s1876_s22  ;;  %s930_s28 = int_to_ptr.vmem [resolvable:$true] %s929_s28 }
  0x64   : > { %1192 = vmatprep.subr.mxu0 %v1616_v8  ;;  %1200 = vmatpush3.msra.mxu1 %v576_v12  ;;  %v571_v25 = vld [vmem:[#allocation7 + $0x10] sm:$0xff]  ;;  %s905_s13 = scalar_lea.sflag [#allocation4], %s1806_s3  ;;  %s1464_s21 = scalar_lea.vmem %s930_s28, 128 }
  0x65   : > { %1193 = vmatpush3.msra.mxu0 %v491_v10  ;;  %1201 = vmatprep.subr.mxu1 %v1616_v8  ;;  %v1151_v36 = vld [vmem:[%s2002_s6] ss:$0 sm:$0xff]  ;;  %p1465_p1 = scmp.ne.s32.totalorder %s930_s28, %s1464_s21  ;;  %s1620_s16 = smov [#allocation10]  }
  0x66   : > { %1194 = vmatprep.subr.mxu0 %v1616_v8  ;;  %1202 = vmatpush3.msra.mxu1 %v575_v13 }
  0x67   : > { %1195 = vmatpush3.msra.mxu0 %v490_v11  ;;  %1203 = vmatprep.subr.mxu1 %v1616_v8  ;;  %p1466_p9 = pnand %p1465_p1, %p1776_p5 }
  0x68   : > { %1210 = vmatprep.subr.mxu0 %v1616_v8  ;;  %1204 = vmatpush3.msra.mxu1 %v574_v14 }
  0x69   : > { %1205 = vmatprep.subr.mxu1 %v1616_v8  ;;  %p1467_p13 = pneg %p1466_p9 }
  0x6a   : > { %1206 = vmatpush3.msra.mxu1 %v573_v26 }
  0x6b   : > { %1221 = vmatprep.subr.mxu1 %v1616_v8 }
  0xea   : > { %v462_v2 = vpop.xlane.xlu0 %461 }
  0xeb   : > { %v464_v3 = vmul.f32 0.03125, %v462_v2 }
  0xed   : > { %v465_v4 = vsub.f32 %v458_v0, %v464_v3 }
  0xef   : > { %v466_v5 = vmul.f32 %v465_v4, %v465_v4 }
  0xf1   : > { %v467_v6 = vsel %vm459_vm0, %v466_v5, 0.0 }
  0xf2   : > { %468 = vadd.xlane.f32.xlu0 %v467_v6 }
 0x17b   : > { %v469_v15 = vpop.xlane.xlu0 %468 }
 0x17c   : > { %v470_v16 = vmul.f32 0.03125, %v469_v15 }
 0x17e   : > { %v471_v17 = vadd.f32 1e-05, %v470_v16 }
 0x180   : > { %1352 = vrsqrt.f32 %v471_v17 }
 0x18d   : > { %v1353_v18 = vpop.eup %1352 }
 0x18e   : > { %v473_v20 = vmul.f32 %v1353_v18, %v465_v4 }
 0x190   : > { %v481_v22 = vmul.f32 %v1146_v19, %v473_v20 }
 0x192   : > { %v489_v23 = vadd.f32 %v1147_v21, %v481_v22 }
 0x194   : > { %1197 = vmatmul.mubr.msk.f32.vlgmr.msra.gmra.mxu0 %vm459_vm0, %v489_v23 }
 0x195   : > { %1211 = vmatpush3.msra.mxu0 %v572_v24  ;;  %1218 = vmatprep.mubr.msk.f32.mxu0 %vm1617_vm1, %v1616_v8 }
 0x196   : > { %1212 = vmatprep.subr.mxu0 %v1616_v8 }
 0x197   : > { %1213 = vmatpush3.msra.mxu0 %v571_v25 }
 0x198   : > { %1214 = vmatprep.subr.mxu0 %v1616_v8 }
 0x199   : > { %1215 = vmatpush3.msra.mxu0 %v570_v27 }
 0x19a   : > { %1216 = vmatprep.subr.mxu0 %v1616_v8 }
 0x19b   : > { %1217 = vmatpush3.msra.mxu0 %v569_v28 }
 0x19c   : > { %1232 = vmatprep.subr.mxu0 %v1616_v8 }
 0x254   : > { %v563_v29 = vpop.f32.mrf.mxu0 }
 0x255   : > { %v568_v30 = vmul.f32 %v563_v29, %v563_v29  ;;  %900 = vrot.lane.b32.xlu0 %v563_v29, %s1618_s23  ;;  %742 = vrot.lane.b32.xlu1 %v563_v29, %s1619_s25  ;;  %s1468_s23 = sshll.u32 %s1620_s16, 4  ;;  %s1469_s23 = int_to_ptr.vmem [resolvable:$false] %s1468_s23 }
 0x256   : > { %1208 = vmatmul.mubr.msk.f32.vlgmr.msra.gmra.mxu1 %vm459_vm0, %v563_v29  ;;  %v1198_v31 = vpop.f32.mrf.mxu0  ;;  %p1471_p2 = scmp.lt.s32.totalorder %s930_s28, %s1469_s23 }
 0x257   : > { %1219 = vmatmul.mubr.msk.f32.vlgmr.msra.gmra.mxu0 %vm459_vm0, %v568_v30  ;;  %1222 = vmatpush3.msra.mxu1 %v576_v12 }
 0x258   : > { %1223 = vmatprep.subr.mxu1 %v1616_v8  ;;  %1233 = vmatpush3.msra.mxu0 %v572_v24 }
 0x259   : > { %816 = vrot.lane.b32.xlu1 %v568_v30, %s1619_s25  ;;  %1224 = vmatpush3.msra.mxu1 %v575_v13  ;;  %s1470_s25 = scalar_lea.vmem %s1469_s23, 256 }
 0x25a   : > { %1225 = vmatprep.subr.mxu1 %v1616_v8  ;;  %1234 = vmatprep.subr.mxu0 %v1616_v8  ;;  %p1472_p4 = scmp.lt.s32.totalorder %s1470_s25, %s1464_s21 }
 0x25b   : > { %1226 = vmatpush3.msra.mxu1 %v574_v14  ;;  %1229 = vmatprep.mubr.msk.f32.mxu1 %vm1617_vm1, %v1616_v8 }
 0x25c   : > { %1227 = vmatprep.subr.mxu1 %v1616_v8  ;;  %1235 = vmatpush3.msra.mxu0 %v571_v25  ;;  %p1473_p6 = por %p1472_p4, %p1471_p2 }
 0x25d   : > { %1228 = vmatpush3.msra.mxu1 %v573_v26  ;;  %1236 = vmatprep.subr.mxu0 %v1616_v8 }
 0x25e   : > { %1237 = vmatpush3.msra.mxu0 %v570_v27  ;;  %1240 = vmatprep.mubr.msk.f32.mxu0 %vm1617_vm1, %v1616_v8  ;;  %p1474_p12 = pnand %p1473_p6, %p1467_p13 }
 0x25f   : > { %1238 = vmatprep.subr.mxu0 %v1616_v8 }
 0x260   : > { %1239 = vmatpush3.msra.mxu0 %v569_v28 }
 0x2c7   : > { %v901_v32 = vpop.permute.xlu0 %900  ;;  %v743_v33 = vpop.permute.xlu1 %742 }
 0x2c8   : > { %903 = vst.msk [vmem:[%s457_s20] sm:$0xff] %vm459_vm0, %v901_v32  ;;  %1230 = vmatmul.mubr.msk.f32.vlgmr.msra.gmra.mxu1 %vm459_vm0, %v743_v33 }
 0x2cb   : > { %v817_v34 = vpop.permute.xlu1 %816 }
 0x2cc   : > { %1241 = vmatmul.mubr.msk.f32.vlgmr.msra.gmra.mxu0 %vm459_vm0, %v817_v34 }
 0x316   : > { %v646_v35 = vpop.f32.mrf.mxu1 }
 0x317   : > { %v719_v37 = vpop.f32.mrf.mxu0 }
 0x318   : > { %v1209_v38 = vpop.f32.mrf.mxu1  ;;  %v720_v39 = vadd.f32 %v719_v37, %v646_v35 }
 0x319   : > { %v1220_v40 = vpop.f32.mrf.mxu0 }
 0x31a   : > { %v729_v41 = vadd.f32 %v1151_v36, %v720_v39 }
 0x31c   : > { %v730_v42 = vmul.f32 1.442695, %v729_v41 }
 0x31e   : > { %1354 = vpow2.f32 %v730_v42 }
 0x32b   : > { %v1355_v43 = vpop.eup %1354 }
 0x32c   : > { %732 = vst.msk [vmem:[%s443_s12] sm:$0xff] %vm459_vm0, %v1355_v43 }
 0x32d   : > { %1477 = shalt.err (!%p1474_p12)
}
 0x32e   : > { %s1478_s27 = scalar_lea.hbm %s1883_s5, 128  ;;  %s1482_s12 = scalar_lea.hbm %s2004_s8, 256 }
 0x32f   : > { %p1479_p0 = scmp.ne.s32.totalorder %s1883_s5, %s1478_s27  ;;  %p1483_p8 = scmp.lt.s32.totalorder %s1883_s5, %s2004_s8 }
 0x330   : > { %p1484_p7 = scmp.lt.s32.totalorder %s1482_s12, %s1478_s27 }
 0x331   : > { %p1480_p3 = pnand %p1479_p0, %p1776_p5 }
 0x332   : > { %p1485_p11 = por %p1484_p7, %p1483_p8 }
 0x333   : > { %p1481_p10 = pneg %p1480_p3 }
 0x335   : > { %p1486_p1 = pnand %p1485_p11, %p1481_p10 }
 0x337   : > { %1489 = shalt.err (!%p1486_p1)
}
 0x338   : > { %1257 = dma.vmem_to_hbm [thread:$0]  (%p1776_p5), %s930_s28, 128, %s1883_s5, %s905_s13   ;;  %v1154_v46 = vld [vmem:[%s2003_s7] ss:$0 sm:$0xff] }
 0x339   : > { %s909_s23 = sand.u32 1, %s1709_s19   ;;  %s450_s25 = scalar_lea.vmem [#allocation11], %s1809_s29 }
 0x33a   : > { %s943_s27 = sshll.u32 %s450_s25, 4  ;;  %s957_s3 = sshll.u32 %s457_s20, 4  ;;  %s1916_s27 = int_to_ptr.vmem [resolvable:$true] %s943_s27  ;;  %s1924_s3 = int_to_ptr.vmem [resolvable:$true] %s957_s3 }
 0x33b   : > { %s1914_s13 = scalar_lea.hbm %s2005_s9, %s1876_s22  ;;  %s1922_s30 = scalar_lea.hbm %s2006_s10, %s1876_s22 }
 0x33c   : > { %s1927_s19 = scalar_lea.sflag [#allocation12], %s909_s23  ;;  %s1490_s29 = scalar_lea.vmem %s1916_s27, 128 }
 0x33d   : > { %p1491_p9 = scmp.ne.s32.totalorder %s1916_s27, %s1490_s29  ;;  %s1621_s20 = smov [#allocation11]  }
 0x33e   : > { %s1494_s4 = sshll.u32 %s1621_s20, 4  ;;  %s1495_s4 = int_to_ptr.vmem [resolvable:$false] %s1494_s4 }
 0x33f   : > { %p1492_p13 = pnand %p1491_p9, %p1776_p5  ;;  %s1496_s21 = scalar_lea.vmem %s1495_s4, 256 }
 0x340   : > { %p1497_p4 = scmp.lt.s32.totalorder %s1916_s27, %s1495_s4  ;;  %p1498_p6 = scmp.lt.s32.totalorder %s1496_s21, %s1490_s29 }
 0x341   : > { %p1493_p2 = pneg %p1492_p13 }
 0x342   : > { %p1499_p12 = por %p1498_p6, %p1497_p4 }
 0x344   : > { %p1500_p0 = pnand %p1499_p12, %p1493_p2 }
 0x388   : > { %v812_v44 = vpop.f32.mrf.mxu1 }
 0x38a   : > { %v1231_v45 = vpop.f32.mrf.mxu1 }
 0x38c   : > { %v886_v47 = vpop.f32.mrf.mxu0 }
 0x38d   : > { %v887_v48 = vadd.f32 %v886_v47, %v812_v44 }
 0x38e   : > { %v1242_v49 = vpop.f32.mrf.mxu0 }
 0x38f   : > { %v896_v50 = vadd.f32 %v1154_v46, %v887_v48 }
 0x391   : > { %v897_v51 = vmul.f32 1.442695, %v896_v50 }
 0x393   : > { %1356 = vpow2.f32 %v897_v51 }
 0x3a0   : > { %v1357_v52 = vpop.eup %1356 }
 0x3a1   : > { %899 = vst.msk [vmem:[%s450_s25] sm:$0xff] %vm459_vm0, %v1357_v52 }
 0x3a2   : > { %1503 = shalt.err (!%p1500_p0)
}
 0x3a3   : > { %s1504_s22 = scalar_lea.hbm %s1914_s13, 128  ;;  %s1508_s25 = scalar_lea.hbm %s2005_s9, 256 }
 0x3a4   : > { %p1505_p3 = scmp.ne.s32.totalorder %s1914_s13, %s1504_s22  ;;  %p1509_p7 = scmp.lt.s32.totalorder %s1914_s13, %s2005_s9 }
 0x3a5   : > { %p1510_p11 = scmp.lt.s32.totalorder %s1508_s25, %s1504_s22 }
 0x3a6   : > { %p1506_p10 = pnand %p1505_p3, %p1776_p5 }
 0x3a7   : > { %p1511_p1 = por %p1510_p11, %p1509_p7 }
 0x3a8   : > { %p1507_p8 = pneg %p1506_p10 }
 0x3aa   : > { %p1512_p9 = pnand %p1511_p1, %p1507_p8 }
 0x3ac   : > { %1515 = shalt.err (!%p1512_p9)
}
 0x3ad   : > { %1258 = dma.vmem_to_hbm [thread:$0]  (%p1776_p5), %s1916_s27, 128, %s1914_s13, %s1927_s19  }
 0x3ae   : > { %s1516_s11 = scalar_lea.vmem %s1924_s3, 128  ;;  %s1622_s12 = smov [#allocation13]  }
 0x3af   : > { %p1517_p13 = scmp.ne.s32.totalorder %s1924_s3, %s1516_s11  ;;  %s1520_s29 = sshll.u32 %s1622_s12, 4  ;;  %s1521_s29 = int_to_ptr.vmem [resolvable:$false] %s1520_s29 }
 0x3b0   : > { %s1522_s20 = scalar_lea.vmem %s1521_s29, 256  ;;  %p1523_p6 = scmp.lt.s32.totalorder %s1924_s3, %s1521_s29 }
 0x3b1   : > { %p1518_p2 = pnand %p1517_p13, %p1776_p5  ;;  %p1524_p12 = scmp.lt.s32.totalorder %s1522_s20, %s1516_s11 }
 0x3b3   : > { %p1519_p4 = pneg %p1518_p2  ;;  %p1525_p0 = por %p1524_p12, %p1523_p6 }
 0x3b5   : > { %p1526_p3 = pnand %p1525_p0, %p1519_p4 }
 0x3b7   : > { %1529 = shalt.err (!%p1526_p3)
}
 0x3b8   : > { %s1530_s4 = scalar_lea.hbm %s1922_s30, 128  ;;  %s1534_s21 = scalar_lea.hbm %s2006_s10, 256 }
 0x3b9   : > { %p1531_p10 = scmp.ne.s32.totalorder %s1922_s30, %s1530_s4  ;;  %p1535_p11 = scmp.lt.s32.totalorder %s1922_s30, %s2006_s10 }
 0x3ba   : > { %p1536_p1 = scmp.lt.s32.totalorder %s1534_s21, %s1530_s4 }
 0x3bb   : > { %p1532_p8 = pnand %p1531_p10, %p1776_p5 }
 0x3bc   : > { %p1537_p9 = por %p1536_p1, %p1535_p11 }
 0x3bd   : > { %p1533_p7 = pneg %p1532_p8 }
 0x3bf   : > { %p1538_p13 = pnand %p1537_p9, %p1533_p7 }
 0x3c1   : > { %1541 = shalt.err (!%p1538_p13)
}
 0x3c2   : > { %1259 = dma.vmem_to_hbm [thread:$0]  (%p1776_p5), %s1924_s3, 128, %s1922_s30, %s1927_s19  }
 0x3c3 PF: > { %s2034_s23 = sld [smem:[#allocation19_spill]]  ;;  %p2037_p4 = scmp.ge.s32.totalorder %s1608_s18, 2 }
 0x3c4   : > { %s2035_s25 = sld [smem:[#allocation20_spill]] }
 0x3c9   : > { %s969_s28 = sand.u32 1, %s2034_s23  }
 0x3ca   : > { %p2036_p2 = scmp.ne.s32.totalorder %s2035_s25, 0  ;;  %s970_s5 = scalar_lea.sflag [#allocation4], %s969_s28 }
 0x3cc   : > { %p1278_p6 = pnand %p2037_p4, %p2036_p2 }
 0x3ce   : > { %p1279_p12 = pneg %p1278_p6 }
 0x3d0   : > { %1579 = dma.done.wait (%p1279_p12), %s970_s5, 128  }
 0x3d1   : > { %1581 = vsyncadd (%p1279_p12), %s970_s5, 4294967168  ;;  %s2038_s11 = sadd.s32 4294967294, %s1608_s18  }
 0x3d2   : > { %s978_s12 = sand.u32 1, %s2038_s11  }
 0x3d3   : > { %s979_s26 = scalar_lea.sflag [#allocation12], %s978_s12 }
 0x3d4   : > { %1583 = dma.done.wait (%p1279_p12), %s979_s26, 256  }
 0x3d5   : > { %1585 = vsyncadd (%p1279_p12), %s979_s26, 4294967040  ;;  %s32_s18 = sadd.s32 1, %s1608_s18   ;;  %s2039_s3 = sld [smem:[#allocation21_spill]] }
 0x3d6   : > { %p29_p5 = scmp.ge.s32.totalorder %s32_s18, 4   ;;  %s2040_s13 = smov %s1592_s14 }
 0x3d7   : > { %s2041_s14 = smov %s1596_s15  ;;  %s2042_s15 = smov %s1788_s24 }
 0x3d8   : > { %s2043_s16 = smov %s1604_s17  ;;  %31 = sbr.rel (!%p29_p5) target bundleno = 14 (0xe), region = 141 }
 0x3db   : > { %s2044_s17 = smov %s2039_s3 }
 0x3dd   :  { %993 = vsyncpa [#allocation3], 1 }
 0x3de   :  { %995 = vsyncpa [#allocation3 + $0x1], 1 }
 0x3df   :  { %996 = vsyncpa [#allocation6], 1 }
 0x3e0   :  { %997 = vsyncpa [#allocation9], 1 }
 0x3e1   :  { %998 = vsyncpa [#allocation4], 1 }
 0x3e2   :  { %1000 = vsyncpa [#allocation4 + $0x1], 1 }
 0x3e3   :  { %1001 = vsyncpa [#allocation12], 1 }
 0x3e4   :  { %1003 = vsyncpa [#allocation12 + $0x1], 1 }

</bundles_post_ra>
